<compile_context>
chip_gen: v7x
topology: tpu7x:2x2x1
jax: 0.10.0
libtpu: 0.0.40
codegen_flags: <defaults>
</compile_context>

<pallas_src>
import functools

import jax
import jax.numpy as jnp
from jax import lax
from jax.experimental import pallas as pl
from jax.experimental.pallas import tpu as pltpu


def _round_up(x, m):
    return (x + m - 1) // m * m


def _pow2_ceil(x):
    x = int(x)
    return 1 if x <= 1 else 1 << (x - 1).bit_length()


def _sublane_multiple(dtype):
    # rows per vreg tile: f32 -> 8, bf16 -> 16, int8 -> 32
    return max(8, 32 // jnp.dtype(dtype).itemsize)


def _chip_params():
    """VMEM-size / TensorCore-count aware tiling knobs (with safe fallbacks)."""
    kind = ""
    try:
        kind = jax.devices()[0].device_kind.lower()
    except Exception:
        kind = ""
    vmem_phys = None
    try:
        info = pltpu.get_tpu_info()
        vmem_phys = int(getattr(info, "vmem_capacity_bytes", 0)) or None
    except Exception:
        vmem_phys = None
    if vmem_phys is None:
        vmem_phys = (64 * 1024 * 1024 if ("v7" in kind or "7x" in kind)
                     else 128 * 1024 * 1024)
    if vmem_phys <= 64 * 1024 * 1024:      # v7x-class: 64 MiB physical VMEM
        max_tile_elems = 512 * 1024        # ~2 MiB per full-block f32 value
        vmem_limit = 48 * 1024 * 1024
    else:                                   # v5e / v6e: 128 MiB physical VMEM
        max_tile_elems = 1024 * 1024       # ~4 MiB per full-block f32 value
        vmem_limit = 96 * 1024 * 1024
    two_tc = any(t in kind for t in ("v7", "7x", "v4", "v5p"))
    return max_tile_elems, vmem_limit, two_tc


def _hinge_loss_kernel(z_ref, y_ref, o_ref, *,
                       margin, power, cost_weighted, uniform,
                       c_pos_scaled, c_neg_scaled,
                       n_total, needs_n_mask):
    nj = pl.program_id(1)
    block_n = z_ref.shape[1]

    @pl.when(nj == 0)
    def _():
        o_ref[...] = jnp.zeros_like(o_ref)

    z = z_ref[...]
    y = y_ref[...]

    # y > 0 on the narrowest safe dtype (native for floats, i32 for int labels).
    if jnp.issubdtype(y_ref.dtype, jnp.floating):
        pos = y > jnp.zeros((), y.dtype)
    else:
        pos = y.astype(jnp.int32) > 0

    # Sign-flip in the input dtype (exact), single upcast to f32:
    # margin - y_new*z  ==  margin - (z if y>0 else -z)
    if jnp.issubdtype(z_ref.dtype, jnp.floating):
        z_signed = jnp.where(pos, z, -z).astype(jnp.float32)
    else:
        zf = z.astype(jnp.float32)
        z_signed = jnp.where(pos, zf, -zf)

    loss = jnp.maximum(jnp.float32(margin) - z_signed, jnp.float32(0.0))

    # Exponent (default 2 -> squared hinge): unrolled VPU multiplies for small
    # integer powers, general pow (EUP) otherwise.
    if float(power).is_integer() and 1 <= int(power) <= 8:
        p = loss
        for _ in range(int(power) - 1):
            p = p * loss
        loss = p
    else:
        # relies on 0**power == 0; power > 0 is asserted in the wrapper
        loss = loss ** jnp.float32(power)

    if uniform:
        weighted = loss                 # single constant scale applied in wrapper
    elif cost_weighted:
        # C_pos/N * y + C_neg/N * (1 - (y > 0))   (matches the PyTorch reference)
        y_f32 = y.astype(jnp.float32)
        w = jnp.float32(c_pos_scaled) * y_f32 + jnp.where(
            pos, jnp.float32(0.0), jnp.float32(c_neg_scaled))
        weighted = loss * w
    else:
        weighted = loss * jnp.where(pos, jnp.float32(c_pos_scaled),
                                    jnp.float32(c_neg_scaled))

    # Ragged lane tail: zero the out-of-range columns (select, so garbage/NaN
    # from out-of-bounds reads cannot leak into the row sums).
    if needs_n_mask:
        lane = lax.broadcasted_iota(jnp.int32, weighted.shape, 1)
        weighted = jnp.where(lane < (n_total - nj * block_n), weighted,
                             jnp.float32(0.0))

    # Fold the lane axis down to 128 with VPU tree adds (block_n is a
    # power-of-two multiple of 128); the single cross-lane reduce happens in
    # the wrapper, outside the hot loop.
    folded = weighted
    while folded.shape[1] > 128:
        half = folded.shape[1] // 2
        folded = folded[:, :half] + folded[:, half:]

    # Output block is the accumulator (index_map (i, 0) keeps it resident
    # across the j axis); written back to HBM once per batch tile.
    o_ref[...] += folded


def hinge_loss(z, y, margin=1.0, power=2, cost_weighted=False,
               C_pos=1.0, C_neg=1.0, *, max_block_n=32768):
    """Pallas implementation of HingeLoss.forward. Returns shape (B,) float32."""
    assert z.ndim == 2 and z.shape == y.shape
    assert float(power) > 0.0, "power must be > 0"
    B, N = z.shape

    max_tile_elems, vmem_limit, two_tc = _chip_params()

    # ---- label (lane) axis: power-of-two multiple of 128 ----
    bn_need = 128 * _pow2_ceil(pl.cdiv(N, 128))        # smallest pow2 cover of N
    bn_cap = min(bn_need, int(max_block_n))
    block_n = min(bn_cap, 2048)

    # ---- batch (row) axis: biggest aligned tile inside the element cap ----
    row_align = max(_sublane_multiple(z.dtype), _sublane_multiple(y.dtype))
    b_rows = _round_up(B, row_align)
    max_rows = max(row_align, (max_tile_elems // block_n) // row_align * row_align)
    block_b = min(max_rows, b_rows)

    # Row-limited (small B): grow the lane tile so per-step DMAs dwarf the
    # ~0.35 us grid-step overhead.
    if block_b == b_rows:
        while block_n < bn_cap and block_b * (block_n * 2) <= max_tile_elems:
            block_n *= 2

    # Only on 2-TensorCore chips (v7x): keep >= 2 batch grid steps when the
    # batch allows it so both cores get work.
    if two_tc and pl.cdiv(B, block_b) < 2 and b_rows >= 2 * row_align:
        block_b = _round_up(pl.cdiv(b_rows, 2), row_align)

    grid_b = pl.cdiv(B, block_b)
    grid_n = pl.cdiv(N, block_n)
    needs_n_mask = (N % block_n) != 0

    # ---- fold 1/N (and constant weights) at trace time ----
    if (not cost_weighted) and float(C_pos) == float(C_neg):
        uniform = True
        uniform_scale = float(C_pos) / float(N)
        c_pos_scaled = c_neg_scaled = 0.0
    else:
        uniform = False
        uniform_scale = None
        c_pos_scaled = float(C_pos) / float(N)
        c_neg_scaled = float(C_neg) / float(N)

    kernel = functools.partial(
        _hinge_loss_kernel,
        margin=float(margin), power=power, cost_weighted=bool(cost_weighted),
        uniform=uniform, c_pos_scaled=c_pos_scaled, c_neg_scaled=c_neg_scaled,
        n_total=N, needs_n_mask=needs_n_mask)

    out = pl.pallas_call(
        kernel,
        out_shape=jax.ShapeDtypeStruct((grid_b * block_b, 128), jnp.float32),
        grid_spec=pltpu.PrefetchScalarGridSpec(
            num_scalar_prefetch=0,
            grid=(grid_b, grid_n),
            in_specs=[
                pl.BlockSpec((block_b, block_n), lambda i, j: (i, j)),
                pl.BlockSpec((block_b, block_n), lambda i, j: (i, j)),
            ],
            out_specs=pl.BlockSpec((block_b, 128), lambda i, j: (i, 0)),
        ),
        compiler_params=pltpu.CompilerParams(
            dimension_semantics=("parallel", "arbitrary"),
            vmem_limit_bytes=int(vmem_limit)),
    )(z, y)

    # Final 128-lane reduce (+ constant 1/N scale on the uniform path) is a
    # tiny XLA op on (B, 128) f32; padded rows are sliced off.
    res = jnp.sum(out[:B], axis=1)
    if uniform:
        res = res * jnp.float32(uniform_scale)
    return res


def hinge_loss_ref(z, y, margin=1.0, power=2, cost_weighted=False,
                   C_pos=1.0, C_neg=1.0):
    """Pure-JAX reference mirroring the PyTorch module."""
    z = z.astype(jnp.float32)
    y = y.astype(jnp.float32)
    y_binary = (y > 0).astype(jnp.float32)
    y_new = 2.0 * y_binary - 1.0
    loss = jax.nn.relu(margin - y_new * z) ** power
    if cost_weighted:
        loss = loss * (C_pos * y + C_neg * (1.0 - y_binary))
    else:
        loss = loss * (C_pos * y_binary + C_neg * (1.0 - y_binary))
    return loss.mean(axis=1)


if __name__ == "__main__":
    key = jax.random.PRNGKey(0)
    kz, ky, kz2, ky2, kz3, ky3 = jax.random.split(key, 6)

    # Case 1: default squared hinge, uniform weights, aligned shapes, f32.
    B, N = 8, 256
    z = jax.random.normal(kz, (B, N), dtype=jnp.float32)
    y = jax.random.bernoulli(ky, p=0.3, shape=(B, N)).astype(jnp.float32)
    out = hinge_loss(z, y, margin=1.0, power=2, cost_weighted=False,
                     C_pos=1.0, C_neg=1.0)
    jax.block_until_ready(out)
    ref = hinge_loss_ref(z, y)
    assert out.shape == (B,)
    assert jnp.allclose(out, ref, atol=1e-5, rtol=1e-5), (out, ref)

    # Case 2: ragged B and N, cost_weighted, power=1, C_pos != C_neg, bf16
    # (exercises in-kernel tail masking, the weighted path, bf16 sign-flip).
    B2, N2 = 6, 300
    z2 = jax.random.normal(kz2, (B2, N2), dtype=jnp.float32).astype(jnp.bfloat16)
    y2 = (2.0 * jax.random.bernoulli(ky2, p=0.4, shape=(B2, N2))).astype(jnp.bfloat16)
    out2 = hinge_loss(z2, y2, margin=0.5, power=1, cost_weighted=True,
                      C_pos=2.0, C_neg=0.5)
    jax.block_until_ready(out2)
    ref2 = hinge_loss_ref(z2, y2, margin=0.5, power=1, cost_weighted=True,
                          C_pos=2.0, C_neg=0.5)
    assert out2.shape == (B2,)
    assert jnp.allclose(out2, ref2, atol=1e-4, rtol=1e-4), (out2, ref2)

    # Case 3: int8 binary labels (narrow-y HBM-traffic path), where-based
    # constant weights with C_pos != C_neg, odd power, ragged N.
    B3, N3 = 12, 200
    z3 = jax.random.normal(kz3, (B3, N3), dtype=jnp.float32)
    y3 = jax.random.bernoulli(ky3, p=0.25, shape=(B3, N3)).astype(jnp.int8)
    out3 = hinge_loss(z3, y3, margin=1.0, power=3, cost_weighted=False,
                      C_pos=3.0, C_neg=0.7)
    jax.block_until_ready(out3)
    ref3 = hinge_loss_ref(z3, y3, margin=1.0, power=3, cost_weighted=False,
                          C_pos=3.0, C_neg=0.7)
    assert out3.shape == (B3,)
    assert jnp.allclose(out3, ref3, atol=1e-4, rtol=1e-5), (out3, ref3)

    print("KERNEL_OK")
</pallas_src>

<mosaic_0001>
module attributes {stable_mosaic.version = 11 : i64} {
  func.func @_hinge_loss_kernel(%arg0: i32, %arg1: i32, %arg2: memref<8x256xf32, #tpu.memory_space<vmem>>, %arg3: memref<8x256xf32, #tpu.memory_space<vmem>>, %arg4: memref<8x128xf32, #tpu.memory_space<vmem>>) attributes {dimension_semantics = [#tpu.dimension_semantics<parallel>, #tpu.dimension_semantics<arbitrary>], iteration_bounds = array<i64: 1, 1>, scalar_prefetch = 0 : i64, scratch_operands = 0 : i64, tpu.core_type = #tpu.core_type<tc>, window_params = [{transform_indices = @transform_0, window_bounds = array<i64: 8, 256>}, {transform_indices = @transform_1, window_bounds = array<i64: 8, 256>}, {transform_indices = @transform_2, window_bounds = array<i64: 8, 128>}]} {
    %c0_i32 = arith.constant 0 : i32
    %0 = arith.cmpi eq, %arg1, %c0_i32 : i32
    %1 = arith.extui %0 : i1 to i32
    %c0_i32_0 = arith.constant 0 : i32
    %2 = arith.cmpi ne, %1, %c0_i32_0 : i32
    scf.if %2 {
      %cst_11 = arith.constant 0.000000e+00 : f32
      %21 = vector.broadcast %cst_11 : f32 to vector<8x128xf32>
      %c0_12 = arith.constant 0 : index
      %c0_13 = arith.constant 0 : index
      %22 = vector.load %arg4[%c0_12, %c0_13] : memref<8x128xf32, #tpu.memory_space<vmem>>, vector<8x128xf32>
      tpu.vector_store %arg4[%c0_12, %c0_13], %21 {strides = array<i32>} : memref<8x128xf32, #tpu.memory_space<vmem>>, vector<8x128xf32>,
    } else {
    }
    %c0 = arith.constant 0 : index
    %c0_1 = arith.constant 0 : index
    %3 = vector.load %arg2[%c0, %c0_1] : memref<8x256xf32, #tpu.memory_space<vmem>>, vector<8x256xf32>
    %c0_2 = arith.constant 0 : index
    %c0_3 = arith.constant 0 : index
    %4 = vector.load %arg3[%c0_2, %c0_3] : memref<8x256xf32, #tpu.memory_space<vmem>>, vector<8x256xf32>
    %cst = arith.constant 0.000000e+00 : f32
    %5 = vector.broadcast %cst : f32 to vector<8x256xf32>
    %6 = arith.cmpf ogt, %4, %5 : vector<8x256xf32>
    %cst_4 = arith.constant 0.000000e+00 : f32
    %7 = vector.broadcast %cst_4 : f32 to vector<8x256xf32>
    %8 = arith.subf %7, %3 : vector<8x256xf32>
    %9 = arith.select %6, %3, %8 : vector<8x256xi1>, vector<8x256xf32>
    %cst_5 = arith.constant 1.000000e+00 : f32
    %10 = vector.broadcast %cst_5 : f32 to vector<8x256xf32>
    %11 = arith.subf %10, %9 : vector<8x256xf32>
    %cst_6 = arith.constant 0.000000e+00 : f32
    %12 = vector.broadcast %cst_6 : f32 to vector<8x256xf32>
    %13 = arith.maximumf %11, %12 : vector<8x256xf32>
    %14 = arith.mulf %13, %13 : vector<8x256xf32>
    %15 = vector.extract_strided_slice %14 {offsets = [0, 0], sizes = [8, 128], strides = [1, 1]} : vector<8x256xf32> to vector<8x128xf32>
    %16 = vector.extract_strided_slice %14 {offsets = [0, 128], sizes = [8, 128], strides = [1, 1]} : vector<8x256xf32> to vector<8x128xf32>
    %17 = arith.addf %15, %16 : vector<8x128xf32>
    %c0_7 = arith.constant 0 : index
    %c0_8 = arith.constant 0 : index
    %18 = vector.load %arg4[%c0_7, %c0_8] : memref<8x128xf32, #tpu.memory_space<vmem>>, vector<8x128xf32>
    %19 = arith.addf %18, %17 : vector<8x128xf32>
    %c0_9 = arith.constant 0 : index
    %c0_10 = arith.constant 0 : index
    %20 = vector.load %arg4[%c0_9, %c0_10] : memref<8x128xf32, #tpu.memory_space<vmem>>, vector<8x128xf32>
    tpu.vector_store %arg4[%c0_9, %c0_10], %19 {strides = array<i32>} : memref<8x128xf32, #tpu.memory_space<vmem>>, vector<8x128xf32>,
    return
  }
  func.func @transform_0(%arg0: i32, %arg1: i32) -> (i32, i32) {
    %c0_i32 = arith.constant 0 : i32
    return %arg0, %arg1 : i32, i32
  }
  func.func @transform_1(%arg0: i32, %arg1: i32) -> (i32, i32) {
    %c0_i32 = arith.constant 0 : i32
    return %arg0, %arg1 : i32, i32
  }
  func.func @transform_2(%arg0: i32, %arg1: i32) -> (i32, i32) {
    %c0_i32 = arith.constant 0 : i32
    %c0_i32_0 = arith.constant 0 : i32
    return %arg0, %c0_i32 : i32, i32
  }
}

</mosaic_0001>

<bundles_post_ra>
// kernel: tpu_custom_call.1
= control target key start
LH: loop header
LB: loop body
LE: loop exit
PB: predicated region body
PF: predicated region fallthrough
CT: control target
= control target key end

     0   :  { %7 = vsyncpa [#allocation3], 0  ;;  %s207_s0 = inlined_call_operand.hbm [shape: f32[8,256], index: 0, kind: input, shape index: {}]   ;;  %s208_s1 = inlined_call_operand.hbm [shape: f32[8,256], index: 1, kind: input, shape index: {}]   ;;  %s209_s2 = inlined_call_operand.hbm [shape: f32[8,128], index: 2, kind: output, shape index: {}]  }
   0x1   :  { %8 = vsyncpa [#allocation6], 0 }
   0x2   :  { %9 = vsyncpa [#allocation4], 0  ;;  %s153_s9 = smov [#allocation2]   ;;  %s154_s11 = smov [#allocation5]  }
   0x3   :  { %s16_s10 = sshll.u32 %s153_s9, 4  ;;  %s26_s12 = sshll.u32 %s154_s11, 4  ;;  %s17_s10 = int_to_ptr.vmem [resolvable:$true] %s16_s10  ;;  %s27_s12 = int_to_ptr.vmem [resolvable:$true] %s26_s12 }
   0x4   :  { %s81_s15 = scalar_lea.hbm %s207_s0, 256 }
   0x5   :  { %p82_p0 = scmp.ne.s32.totalorder %s207_s0, %s81_s15  ;;  %p85_p1 = scmp.lt.u32.totalorder %s81_s15, %s207_s0 }
   0x7   :  { %p87_p2 = pnand %p85_p1, %p82_p0 }
   0x9   :  { %90 = shalt.err (!%p87_p2)
}
   0xa   :  { %s91_s20 = scalar_lea.vmem %s17_s10, 256  ;;  %p96_p4 = scmp.lt.s32.totalorder %s17_s10, %s17_s10 }
   0xb   :  { %p92_p3 = scmp.ne.s32.totalorder %s17_s10, %s91_s20  ;;  %p97_p5 = scmp.lt.s32.totalorder %s91_s20, %s91_s20 }
   0xd   :  { %p98_p6 = por %p97_p5, %p96_p4 }
   0xf   :  { %p99_p7 = pnand %p98_p6, %p92_p3 }
  0x11   :  { %102 = shalt.err (!%p99_p7)
}
  0x12   :  { %19 = dma.hbm_to_vmem [thread:$0]  %s207_s0, 256, %s17_s10, [#allocation3]  }
  0x13   :  { %s103_s25 = scalar_lea.hbm %s208_s1, 256 }
  0x14   :  { %p104_p8 = scmp.ne.s32.totalorder %s208_s1, %s103_s25  ;;  %p107_p9 = scmp.lt.u32.totalorder %s103_s25, %s208_s1 }
  0x16   :  { %p109_p10 = pnand %p107_p9, %p104_p8 }
  0x18   :  { %112 = shalt.err (!%p109_p10)
}
  0x19   :  { %s113_s30 = scalar_lea.vmem %s27_s12, 256  ;;  %p118_p12 = scmp.lt.s32.totalorder %s27_s12, %s27_s12 }
  0x1a   :  { %p114_p11 = scmp.ne.s32.totalorder %s27_s12, %s113_s30  ;;  %p119_p13 = scmp.lt.s32.totalorder %s113_s30, %s113_s30 }
  0x1c   :  { %p120_p0 = por %p119_p13, %p118_p12 }
  0x1e   :  { %p121_p1 = pnand %p120_p0, %p114_p11 }
  0x20   :  { %124 = shalt.err (!%p121_p1)
}
  0x21   :  { %29 = dma.hbm_to_vmem [thread:$0]  %s208_s1, 256, %s27_s12, [#allocation6]  }
  0x22   :  { %147 = dma.done.wait [#allocation3], 256  }
  0x23   :  { %148 = vsyncadd [#allocation3], 4294967040 }
  0x24   :  { %149 = dma.done.wait [#allocation6], 256  }
  0x25   :  { %150 = vsyncadd [#allocation6], 4294967040  ;;  %v41_v0 = vld [vmem:[#allocation2] sm:$0xff]  ;;  %v42_v1 = vld [vmem:[#allocation2 + $0x8] sm:$0xff]  ;;  %s155_s1 = smov [#allocation7]  }
  0x26   :  { %v43_v2 = vld [vmem:[#allocation5] sm:$0xff]  ;;  %v44_v3 = vld [vmem:[#allocation5 + $0x8] sm:$0xff]  ;;  %v47_v4 = vsub.f32 0.0, %v41_v0  ;;  %v48_v5 = vsub.f32 0.0, %v42_v1  ;;  %s67_s4 = sshll.u32 %s155_s1, 4  ;;  %s68_s4 = int_to_ptr.vmem [resolvable:$true] %s67_s4 }
  0x27   :  { %vm45_vm0 = vcmp.gt.f32.partialorder %v43_v2, 0.0  ;;  %vm46_vm1 = vcmp.gt.f32.partialorder %v44_v3, 0.0  ;;  %s125_s5 = scalar_lea.vmem %s68_s4, 128  ;;  %p130_p3 = scmp.lt.s32.totalorder %s68_s4, %s68_s4 }
  0x28   :  { %v49_v6 = vsel %vm45_vm0, %v41_v0, %v47_v4  ;;  %v50_v7 = vsel %vm46_vm1, %v42_v1, %v48_v5  ;;  %p126_p2 = scmp.ne.s32.totalorder %s68_s4, %s125_s5  ;;  %p131_p4 = scmp.lt.s32.totalorder %s125_s5, %s125_s5 }
  0x29   :  { %v51_v8 = vsub.f32 1.0, %v49_v6  ;;  %v52_v9 = vsub.f32 1.0, %v50_v7 }
  0x2a   :  { %p132_p5 = por %p131_p4, %p130_p3 }
  0x2b   :  { %v53_v10 = vmax.f32 %v51_v8, 0.0  ;;  %v54_v11 = vmax.f32 %v52_v9, 0.0 }
  0x2c   :  { %p133_p6 = pnand %p132_p5, %p126_p2 }
  0x2d   :  { %v55_v12 = vmul.f32 %v53_v10, %v53_v10  ;;  %v56_v13 = vmul.f32 %v54_v11, %v54_v11 }
  0x2f   :  { %v57_v14 = vadd.f32 %v56_v13, %v55_v12 }
  0x31   :  { %60 = vst [vmem:[#allocation7] sm:$0xff] %v57_v14 }
  0x32   :  { %136 = shalt.err (!%p133_p6)
}
  0x33   :  { %s137_s8 = scalar_lea.hbm %s209_s2, 128 }
  0x34   :  { %p138_p7 = scmp.ne.s32.totalorder %s209_s2, %s137_s8  ;;  %p141_p8 = scmp.lt.u32.totalorder %s137_s8, %s209_s2 }
  0x36   :  { %p143_p9 = pnand %p141_p8, %p138_p7 }
  0x38   :  { %146 = shalt.err (!%p143_p9)
}
  0x39   :  { %70 = dma.vmem_to_hbm [thread:$0]  %s68_s4, 128, %s209_s2, [#allocation4]  }
  0x3a   :  { %151 = dma.done.wait [#allocation4], 128  }
  0x3b   :  { %152 = vsyncadd [#allocation4], 4294967168 }
  0x3c   :  { %74 = vsyncpa [#allocation3], 1 }
  0x3d   :  { %75 = vsyncpa [#allocation6], 1 }
  0x3e   :  { %76 = vsyncpa [#allocation4], 1 }

</bundles_post_ra>
